<compile_context>
chip_gen: v7x
topology: tpu7x:2x2x1
jax: 0.10.0
libtpu: 0.0.40
codegen_flags: <defaults>
</compile_context>

<pallas_src>
import functools
import math

import jax
import jax.numpy as jnp
from jax.experimental import pallas as pl
from jax.experimental.pallas import tpu as pltpu

_INV_SQRT2 = 1.0 / math.sqrt(2.0)

# Resident-W footprint budget (bytes).  Chosen to fit v7x's 64 MiB per-TC VMEM
# with headroom; v5e/v6e (128 MiB) have ample margin.
_RESIDENT_VMEM_BUDGET = 44 * 1024 * 1024


def _exact_gelu_f32(x):
    # ACT2FN['gelu'] in HF == erf-based GELU: 0.5 * x * (1 + erf(x / sqrt(2)))
    return 0.5 * x * (1.0 + jax.lax.erf(x * _INV_SQRT2))


def _round_up(x, m):
    return ((x + m - 1) // m) * m


def _cdiv(a, b):
    return -(-a // b)


def _spec(block_shape, index_map, *, buffers=None):
    """BlockSpec with an optional explicit buffer depth.

    buffers=1 + constant index_map => operand is DMA'd once and kept
    VMEM-resident (single buffer).  Falls back to the default (double-
    buffered) spec if this JAX version does not expose pipeline_mode.
    """
    if buffers is not None and hasattr(pl, "Buffered"):
        try:
            return pl.BlockSpec(block_shape, index_map,
                                pipeline_mode=pl.Buffered(buffers))
        except TypeError:
            pass
    return pl.BlockSpec(block_shape, index_map)


# ----------------------------------------------------------------------------
# Kernels
# ----------------------------------------------------------------------------
def _resident_kernel(x_ref, wt_ref, b_ref, o_ref):
    # x_ref : (tm, K)      audio-feature row tile (model dtype)
    # wt_ref: (K, N_pad)   full pre-transposed weight, VMEM-resident
    # b_ref : (1, N_pad)   bias row, f32
    # o_ref : (tm, N_pad)  output row tile
    h = _exact_gelu_f32(x_ref[...].astype(jnp.float32))
    # MXU operands in the weight dtype (bf16 for real checkpoints), f32 acc.
    acc = jnp.dot(h.astype(wt_ref.dtype), wt_ref[...],
                  preferred_element_type=jnp.float32)
    o_ref[...] = (acc + b_ref[...]).astype(o_ref.dtype)


def _streamed_kernel(x_ref, wt_ref, b_ref, o_ref, h_ref):
    # Fallback for very large N (W^T does not fit VMEM): columns streamed,
    # gelu(x) computed once per row tile and cached in VMEM scratch.
    @pl.when(pl.program_id(1) == 0)
    def _():
        h_ref[...] = _exact_gelu_f32(
            x_ref[...].astype(jnp.float32)).astype(h_ref.dtype)

    acc = jnp.dot(h_ref[...], wt_ref[...], preferred_element_type=jnp.float32)
    o_ref[...] = (acc + b_ref[...]).astype(o_ref.dtype)


# ----------------------------------------------------------------------------
# Parameter preparation (runs ONCE at load time, outside the jitted forward)
# ----------------------------------------------------------------------------
def prepare_projector_params(weight, bias, *, param_dtype=None):
    """Pre-transpose / pad the nn.Linear parameters.

    weight: (hidden_size, output_dim)   -- torch nn.Linear layout (N, K)
    bias:   (hidden_size,)
    param_dtype: optionally cast the weight once here (e.g. jnp.bfloat16 for
      f32 checkpoints -> native MXU path, half the resident VMEM).

    Returns (wt, b_row, n_out):
      wt:    (K, N_pad)  pre-transposed, N padded to a multiple of 128
      b_row: (1, N_pad)  bias in f32 (padded)
      n_out: original hidden_size (for slicing the kernel output)
    """
    n, k = weight.shape
    wt = jnp.asarray(weight).T                      # (K, N)
    if param_dtype is not None:
        wt = wt.astype(param_dtype)
    n_pad = _round_up(n, 128)
    if n_pad != n:
        wt = jnp.pad(wt, ((0, 0), (0, n_pad - n)))
    b_row = jnp.asarray(bias, jnp.float32)
    if n_pad != n:
        b_row = jnp.pad(b_row, (0, n_pad - n))
    b_row = b_row.reshape(1, n_pad)
    return wt, b_row, n


# ----------------------------------------------------------------------------
# Forward
# ----------------------------------------------------------------------------
@functools.partial(jax.jit, static_argnames=("n_out", "tm", "tn"))
def aero_audio_projector(audio_features, wt, b_row, *, n_out, tm=256, tn=512):
    """Projector forward.

    audio_features: (..., K)
    wt:             (K, N_pad)  from prepare_projector_params
    b_row:          (1, N_pad)  from prepare_projector_params
    n_out:          original hidden_size (static)
    returns:        (..., n_out) in audio_features.dtype
    """
    *lead, K = audio_features.shape
    Kw, N_pad = wt.shape
    assert Kw == K, "weight/feature dim mismatch"

    M = 1
    for d in lead:
        M *= d
    out_dtype = audio_features.dtype
    x2d = audio_features.reshape(M, K)

    # Balanced row tile: multiple of 8, <= tm, padding waste < 8 rows / tile.
    n_row_tiles = max(1, _cdiv(M, tm))
    tm_eff = _round_up(_cdiv(M, n_row_tiles), 8)
    M_pad = n_row_tiles * tm_eff
    if M_pad != M:
        x2d = jnp.pad(x2d, ((0, M_pad - M), (0, 0)))

    # Resident-W VMEM estimate: single-buffered W^T + double-buffered x/out
    # tiles + bias + f32 GELU / accumulator temporaries.
    xb = jnp.dtype(x2d.dtype).itemsize
    wb = jnp.dtype(wt.dtype).itemsize
    ob = jnp.dtype(out_dtype).itemsize
    resident_bytes = (
        K * N_pad * wb
        + 2 * tm_eff * K * xb
        + 2 * tm_eff * N_pad * ob
        + 2 * N_pad * 4
        + tm_eff * K * 4
        + tm_eff * N_pad * 4)

    if resident_bytes <= _RESIDENT_VMEM_BUDGET:
        # -------- Resident-W path: 1-D grid over row tiles ------------------
        vmem_limit = None
        if resident_bytes > 24 * 1024 * 1024:
            vmem_limit = min(56 * 1024 * 1024,
                             max(32 * 1024 * 1024, int(resident_bytes * 1.3)))
        out2d = pl.pallas_call(
            _resident_kernel,
            out_shape=jax.ShapeDtypeStruct((M_pad, N_pad), out_dtype),
            grid_spec=pltpu.PrefetchScalarGridSpec(
                num_scalar_prefetch=0,
                grid=(M_pad // tm_eff,),
                in_specs=[
                    pl.BlockSpec((tm_eff, K), lambda i: (i, 0)),     # x tile
                    _spec((K, N_pad), lambda i: (0, 0), buffers=1),  # W^T res.
                    _spec((1, N_pad), lambda i: (0, 0), buffers=1),  # bias
                ],
                out_specs=pl.BlockSpec((tm_eff, N_pad), lambda i: (i, 0)),
            ),
            compiler_params=pltpu.CompilerParams(
                dimension_semantics=("parallel",),
                vmem_limit_bytes=vmem_limit),
        )(x2d, wt, b_row)
    else:
        # -------- Streamed fallback (huge N): cache gelu(x) per row tile ----
        tn_eff = 128 * math.gcd(N_pad // 128, max(1, tn // 128))
        out2d = pl.pallas_call(
            _streamed_kernel,
            out_shape=jax.ShapeDtypeStruct((M_pad, N_pad), out_dtype),
            grid_spec=pltpu.PrefetchScalarGridSpec(
                num_scalar_prefetch=0,
                grid=(M_pad // tm_eff, N_pad // tn_eff),
                in_specs=[
                    pl.BlockSpec((tm_eff, K), lambda i, j: (i, 0)),
                    pl.BlockSpec((K, tn_eff), lambda i, j: (0, j)),
                    pl.BlockSpec((1, tn_eff), lambda i, j: (0, j)),
                ],
                out_specs=pl.BlockSpec((tm_eff, tn_eff), lambda i, j: (i, j)),
                scratch_shapes=[pltpu.VMEM((tm_eff, K), wt.dtype)],
            ),
            compiler_params=pltpu.CompilerParams(
                dimension_semantics=("parallel", "arbitrary")),
        )(x2d, wt, b_row)

    out2d = out2d[:M, :n_out]
    return out2d.reshape(*lead, n_out)


# ----------------------------------------------------------------------------
# Reference + self-test
# ----------------------------------------------------------------------------
def _reference(audio_features, weight, bias):
    h = _exact_gelu_f32(audio_features.astype(jnp.float32))
    y = jnp.einsum("bsd,nd->bsn", h, weight.astype(jnp.float32)) + bias
    return y.astype(audio_features.dtype)


if __name__ == "__main__":
    # Small synthetic config: audio output_dim=32, text hidden_size=64.
    B, S, D_IN, HIDDEN = 2, 8, 32, 64

    key = jax.random.PRNGKey(0)
    k_x, k_w, k_b = jax.random.split(key, 3)

    audio_features = jax.random.normal(k_x, (B, S, D_IN), dtype=jnp.float32)
    # Deterministic parameter init (nn.Linear-style uniform bound).
    bound = 1.0 / math.sqrt(D_IN)
    weight = jax.random.uniform(k_w, (HIDDEN, D_IN), dtype=jnp.float32,
                                minval=-bound, maxval=bound)
    bias = jax.random.uniform(k_b, (HIDDEN,), dtype=jnp.float32,
                              minval=-bound, maxval=bound)

    # One-time parameter prep ("parameter load"), outside the jitted forward.
    # For real bf16 checkpoints pass param_dtype=jnp.bfloat16 here; the f32
    # self-test keeps f32 so the tight tolerance below is meaningful.
    wt, b_row, n_out = prepare_projector_params(weight, bias)

    out = aero_audio_projector(audio_features, wt, b_row, n_out=n_out)
    out = jax.block_until_ready(out)

    ref = _reference(audio_features, weight, bias)
    assert out.shape == (B, S, HIDDEN)
    assert jnp.allclose(out, ref, atol=1e-5, rtol=1e-5), "mismatch vs reference"

    print("KERNEL_OK")
</pallas_src>

<mosaic_0001>
module attributes {stable_mosaic.version = 11 : i64} {
  func.func @_resident_kernel(%arg0: i32, %arg1: memref<16x32xf32, #tpu.memory_space<vmem>>, %arg2: memref<32x128xf32, #tpu.memory_space<vmem>>, %arg3: memref<1x128xf32, #tpu.memory_space<vmem>>, %arg4: memref<16x128xf32, #tpu.memory_space<vmem>>) attributes {dimension_semantics = [#tpu.dimension_semantics<parallel>], iteration_bounds = array<i64: 1>, scalar_prefetch = 0 : i64, scratch_operands = 0 : i64, tpu.core_type = #tpu.core_type<tc>, window_params = [{transform_indices = @transform_0, window_bounds = array<i64: 16, 32>}, {pipeline_mode = #tpu.pipeline_mode<synchronous>, transform_indices = @transform_1, window_bounds = array<i64: 32, 128>}, {pipeline_mode = #tpu.pipeline_mode<synchronous>, transform_indices = @transform_2, window_bounds = array<i64: 1, 128>}, {transform_indices = @transform_3, window_bounds = array<i64: 16, 128>}]} {
    %c0 = arith.constant 0 : index
    %c0_0 = arith.constant 0 : index
    %0 = vector.load %arg1[%c0, %c0_0] : memref<16x32xf32, #tpu.memory_space<vmem>>, vector<16x32xf32>
    %cst = arith.constant 5.000000e-01 : f32
    %1 = vector.broadcast %cst : f32 to vector<16x32xf32>
    %2 = arith.mulf %1, %0 : vector<16x32xf32>
    %cst_1 = arith.constant 0.707106769 : f32
    %3 = vector.broadcast %cst_1 : f32 to vector<16x32xf32>
    %4 = arith.mulf %0, %3 : vector<16x32xf32>
    %5 = math.erf %4 : vector<16x32xf32>
    %cst_2 = arith.constant 1.000000e+00 : f32
    %6 = vector.broadcast %cst_2 : f32 to vector<16x32xf32>
    %7 = arith.addf %6, %5 : vector<16x32xf32>
    %8 = arith.mulf %2, %7 : vector<16x32xf32>
    %c0_3 = arith.constant 0 : index
    %c0_4 = arith.constant 0 : index
    %9 = vector.load %arg2[%c0_3, %c0_4] : memref<32x128xf32, #tpu.memory_space<vmem>>, vector<32x128xf32>
    %cst_5 = arith.constant dense<0.000000e+00> : vector<16x128xf32>
    %10 = tpu.matmul %8, %9, %cst_5 {dimension_numbers = #tpu.dot_dimension_numbers<[1], [0], [0], [1], [0, 0, 1, 1], [], []>} : vector<16x32xf32>, vector<32x128xf32>, vector<16x128xf32> -> vector<16x128xf32>
    %c0_6 = arith.constant 0 : index
    %c0_7 = arith.constant 0 : index
    %11 = vector.load %arg3[%c0_6, %c0_7] : memref<1x128xf32, #tpu.memory_space<vmem>>, vector<1x128xf32>
    %12 = vector.broadcast %11 : vector<1x128xf32> to vector<16x128xf32>
    %13 = arith.addf %10, %12 : vector<16x128xf32>
    %c0_8 = arith.constant 0 : index
    %c0_9 = arith.constant 0 : index
    %14 = vector.load %arg4[%c0_8, %c0_9] : memref<16x128xf32, #tpu.memory_space<vmem>>, vector<16x128xf32>
    tpu.vector_store %arg4[%c0_8, %c0_9], %13 {strides = array<i32>} : memref<16x128xf32, #tpu.memory_space<vmem>>, vector<16x128xf32>,
    return
  }
  func.func @transform_0(%arg0: i32) -> (i32, i32) {
    %c0_i32 = arith.constant 0 : i32
    %c0_i32_0 = arith.constant 0 : i32
    return %arg0, %c0_i32 : i32, i32
  }
  func.func @transform_1(%arg0: i32) -> (i32, i32) {
    %c0_i32 = arith.constant 0 : i32
    %c0_i32_0 = arith.constant 0 : i32
    %c0_i32_1 = arith.constant 0 : i32
    return %c0_i32, %c0_i32_0 : i32, i32
  }
  func.func @transform_2(%arg0: i32) -> (i32, i32) {
    %c0_i32 = arith.constant 0 : i32
    %c0_i32_0 = arith.constant 0 : i32
    %c0_i32_1 = arith.constant 0 : i32
    return %c0_i32, %c0_i32_0 : i32, i32
  }
  func.func @transform_3(%arg0: i32) -> (i32, i32) {
    %c0_i32 = arith.constant 0 : i32
    %c0_i32_0 = arith.constant 0 : i32
    return %arg0, %c0_i32 : i32, i32
  }
}

</mosaic_0001>

<bundles_post_ra>
// kernel: aero_audio_projector.1
= control target key start
LH: loop header
LB: loop body
LE: loop exit
PB: predicated region body
PF: predicated region fallthrough
CT: control target
= control target key end

     0   :  { %8 = vsyncpa [#allocation3], 0  ;;  %s296_s0 = inlined_call_operand.hbm [shape: f32[16,32], index: 0, kind: input, shape index: {}]   ;;  %s297_s1 = inlined_call_operand.hbm [shape: f32[32,128], index: 1, kind: input, shape index: {}]   ;;  %s298_s2 = inlined_call_operand.vmem [shape: f32[1,128], index: 2, kind: input, shape index: {}]   ;;  %s299_s3 = inlined_call_operand.vmem [shape: f32[16,128], index: 3, kind: output, shape index: {}]  }
   0x1   :  { %9 = vsyncpa [#allocation5], 0  ;;  %s239_s12 = smov [#allocation2]   ;;  %s191_s16 = scalar_lea.hbm %s296_s0, 256 }
   0x2   :  { %s15_s13 = sshll.u32 %s239_s12, 4  ;;  %p192_p0 = scmp.ne.s32.totalorder %s296_s0, %s191_s16  ;;  %s16_s13 = int_to_ptr.vmem [resolvable:$true] %s15_s13 }
   0x3   :  { %p195_p1 = scmp.lt.u32.totalorder %s191_s16, %s296_s0 }
   0x5   :  { %p197_p2 = pnand %p195_p1, %p192_p0 }
   0x7   :  { %200 = shalt.err (!%p197_p2)
}
   0x8   :  { %s201_s21 = scalar_lea.vmem %s16_s13, 256  ;;  %p206_p4 = scmp.lt.s32.totalorder %s16_s13, %s16_s13 }
   0x9   :  { %p202_p3 = scmp.ne.s32.totalorder %s16_s13, %s201_s21  ;;  %p207_p5 = scmp.lt.s32.totalorder %s201_s21, %s201_s21 }
   0xb   :  { %p208_p6 = por %p207_p5, %p206_p4 }
   0xd   :  { %p209_p7 = pnand %p208_p6, %p202_p3 }
   0xf   :  { %212 = shalt.err (!%p209_p7)
}
  0x10   :  { %s240_s22 = smov 128   ;;  %s241_s23 = smov 8  }
  0x11   :  { %21 = dma.hbm_to_vmem [thread:$0]  %s296_s0, 256, %s16_s13, [#allocation3], %s240_s22, %s240_s22, %s241_s23  }
  0x12   :  { %s242_s26 = smov [#allocation4]   ;;  %s213_s30 = scalar_lea.hbm %s297_s1, 512 }
  0x13   :  { %s27_s27 = sshll.u32 %s242_s26, 4  ;;  %p214_p8 = scmp.ne.s32.totalorder %s297_s1, %s213_s30  ;;  %s28_s27 = int_to_ptr.vmem [resolvable:$true] %s27_s27 }
  0x14   :  { %p217_p9 = scmp.lt.u32.totalorder %s213_s30, %s297_s1 }
  0x16   :  { %p219_p10 = pnand %p217_p9, %p214_p8 }
  0x18   :  { %222 = shalt.err (!%p219_p10)
}
  0x19   :  { %s223_s8 = scalar_lea.vmem %s28_s27, 512  ;;  %p228_p12 = scmp.lt.s32.totalorder %s28_s27, %s28_s27 }
  0x1a   :  { %p224_p11 = scmp.ne.s32.totalorder %s28_s27, %s223_s8  ;;  %p229_p13 = scmp.lt.s32.totalorder %s223_s8, %s223_s8 }
  0x1c   :  { %p230_p0 = por %p229_p13, %p228_p12 }
  0x1e   :  { %p231_p1 = pnand %p230_p0, %p224_p11 }
  0x20   :  { %234 = shalt.err (!%p231_p1)
}
  0x21   :  { %33 = dma.hbm_to_vmem [thread:$0]  %s297_s1, 512, %s28_s27, [#allocation5], %s240_s22, %s240_s22, %s241_s23  }
  0x22   :  { %235 = dma.done.wait [#allocation3], 256  }
  0x23   :  { %236 = vsyncadd [#allocation3], 4294967040 }
  0x24   :  { %237 = dma.done.wait [#allocation5], 512  }
  0x25   :  { %238 = vsyncadd [#allocation5], 4294966784  ;;  %v54_v0 = vld [vmem:[#allocation4] sm:$0xff]  ;;  %v55_v1 = vld [vmem:[#allocation4 + $0x8] sm:$0xff]  ;;  %vm65_vm0 = vcmask 261120  }
  0x26   :  { %v56_v2 = vld [vmem:[#allocation4 + $0x10] sm:$0xff]  ;;  %v175_v3 = vpack.c.bf16 %v55_v1, %v54_v0  ;;  %v57_v4 = vld [vmem:[#allocation4 + $0x18] sm:$0xff] }
  0x27   :  { %v42_v5 = vld [vmem:[#allocation2] sm:$0xff]  ;;  %v43_v6 = vld [vmem:[#allocation2 + $0x8] sm:$0xff]  ;;  %v179_v7 = vpack.c.bf16 %v57_v4, %v56_v2 }
  0x28   :  { %v46_v8 = vmul.f32 0.70710677, %v42_v5  ;;  %176 = vmatprep.subr.bf16.mxu0 %v175_v3  ;;  %v47_v9 = vmul.f32 0.70710677, %v43_v6  ;;  %v44_v10 = vmul.f32 0.5, %v42_v5  ;;  %v45_v12 = vmul.f32 0.5, %v43_v6 }
  0x29   :  { %178 = vmatpush3.bf16.msra.mxu0 %v175_v3  ;;  %v155_v18 = vld [vmem:[%s298_s2] ss:$0 sm:$0xff] }
  0x2a   :  { %187 = verf.f32 %v46_v8  ;;  %180 = vmatprep.subr.bf16.mxu0 %v179_v7 }
  0x2b   :  { %189 = verf.f32 %v47_v9 }
  0x2d   :  { %182 = vmatpush3.bf16.msra.mxu0 %v179_v7 }
  0x34   :  { %v188_v11 = vpop.eup %187 }
  0x35   :  { %v190_v13 = vpop.eup %189  ;;  %v50_v14 = vadd.f32 1.0, %v188_v11 }
  0x36   :  { %v51_v15 = vadd.f32 1.0, %v190_v13 }
  0x37   :  { %v52_v16 = vmul.f32 %v50_v14, %v44_v10 }
  0x38   :  { %v53_v17 = vmul.f32 %v51_v15, %v45_v12 }
  0x39   :  { %172 = vmatprep.mubr.msk.f32.mxu0 %vm65_vm0, %v52_v16 }
  0x3a   :  { %173 = vmatmul.mubr.msk.f32.vlgmr.msra.gmra.mrb[0].mxu0 %vm65_vm0, %v53_v17 }
 0x10d   :  { %v174_v19 = vpop.f32.mrb[0].mxu0 }
 0x10e   :  { %v144_v20 = vadd.f32 %v174_v19, %v155_v18  ;;  %v138_v21 = vpop.f32.mrb[1].mxu0 }
 0x10f   :  { %v139_v22 = vadd.f32 %v155_v18, %v138_v21 }
 0x110   :  { %148 = vst [vmem:[%s299_s3 + $0x8] sm:$0xff] %v144_v20 }
 0x111   :  { %147 = vst [vmem:[%s299_s3] sm:$0xff] %v139_v22 }
 0x112   :  { %153 = vsyncpa [#allocation3], 1 }
 0x113   :  { %154 = vsyncpa [#allocation5], 1 }

</bundles_post_ra>
